<compile_context>
chip_gen: v5e
topology: v5e:2x2
jax: 0.10.0
libtpu: 0.0.40
codegen_flags: <defaults>
</compile_context>

<pallas_src>
import numpy as np
import jax
import jax.numpy as jnp
from jax.experimental import pallas as pl
from jax.experimental.pallas import tpu as pltpu

# ---- small, module-consistent synthetic config -------------------------------
B, S = 2, 8          # batch, number of time points (sequence)
L = 1                # Taos_input_token_len (config default)
H = 128              # Taos_hidden_size (kept a multiple of 128 -> lane-dense)


# ------------------------------- kernel ---------------------------------------
def point_embedding_kernel(x_ref, wg_ref, we_ref, o_ref):
    """o = silu(x @ Wg) * (x @ We); K = 1 path uses a VPU broadcast multiply."""
    x = x_ref[...]                                   # (TM, L) f32
    l = x.shape[-1]

    if l == 1:
        # K=1 "matmul" == rank-1 broadcast: (TM,1) * (1,H) -> (TM,H) on the VPU.
        g = x * wg_ref[...]
        e = x * we_ref[...]
    else:
        g = jnp.dot(x, wg_ref[...], preferred_element_type=jnp.float32)
        e = jnp.dot(x, we_ref[...], preferred_element_type=jnp.float32)

    # SiLU(gate) * emb; sigmoid rides the EUP slot. Cast only at the store.
    o_ref[...] = ((g * jax.nn.sigmoid(g)) * e).astype(o_ref.dtype)


# ------------------------------- wrapper ---------------------------------------
def taos_point_embedding(x, w_gate, w_emb, *, tile_rows=1024, out_dtype=None):
    """x: (B, S, L); w_gate / w_emb: (L, H) (i.e. torch weight.T)."""
    b, s, l = x.shape
    h = w_gate.shape[1]
    if out_dtype is None:
        out_dtype = x.dtype
    n = b * s

    # flatten batch*seq into one row axis, keep arithmetic in f32
    x2 = x.reshape(n, l).astype(jnp.float32)

    # tile: full slab (single grid step) for small N, row-tiled for large N
    tm = min(tile_rows, ((n + 7) // 8) * 8)
    tm = max(8, ((tm + 7) // 8) * 8)          # sublane-aligned

    # pad rows UP to a multiple of tm (pad costs only 4 B/row at L=1);
    # padded rows produce silu(0)*0 = 0 and are sliced off below.
    n_tot = ((n + tm - 1) // tm) * tm
    if n_tot != n:
        x2 = jnp.pad(x2, ((0, n_tot - n), (0, 0)))

    out2 = pl.pallas_call(
        point_embedding_kernel,
        out_shape=jax.ShapeDtypeStruct((n_tot, h), out_dtype),
        grid_spec=pltpu.PrefetchScalarGridSpec(
            num_scalar_prefetch=0,
            grid=(n_tot // tm,),
            in_specs=[
                pl.BlockSpec((tm, l), lambda i: (i, 0)),    # activations
                pl.BlockSpec((l, h), lambda i: (0, 0)),     # gate weight
                pl.BlockSpec((l, h), lambda i: (0, 0)),     # emb  weight
            ],
            out_specs=pl.BlockSpec((tm, h), lambda i: (i, 0)),  # lane-dense out
        ),
        compiler_params=pltpu.CompilerParams(
            dimension_semantics=("parallel",)),              # megacore on v7x
    )(x2, w_gate.astype(jnp.float32), w_emb.astype(jnp.float32))

    return out2[:n].reshape(b, s, h)


# ------------------------- pure-JAX reference (PyTorch semantics) ---------------
def reference(x, w_gate, w_emb):
    g = x @ w_gate          # gate_layer(x)
    e = x @ w_emb           # emb_layer(x)
    return jax.nn.silu(g) * e


# ------------------------------------ main --------------------------------------
if __name__ == "__main__":
    key = jax.random.PRNGKey(0)
    kx, kg, ke = jax.random.split(key, 3)

    x = jax.random.normal(kx, (B, S, L), jnp.float32)
    # weights stored as (in, out) so the kernel computes x @ W (== torch x @ W.T)
    w_gate = jax.random.normal(kg, (L, H), jnp.float32)
    w_emb = jax.random.normal(ke, (L, H), jnp.float32)

    out = taos_point_embedding(x, w_gate, w_emb)
    jax.block_until_ready(out)

    ref = reference(x, w_gate, w_emb)
    assert out.shape == (B, S, H)
    np.testing.assert_allclose(np.asarray(out), np.asarray(ref),
                               rtol=1e-5, atol=1e-5)

    # also exercise a non-divisible / multi-tile row count to check padding path
    x_big = jax.random.normal(kx, (5, 413, L), jnp.float32)     # N = 2065
    out_big = taos_point_embedding(x_big, w_gate, w_emb, tile_rows=1024)
    jax.block_until_ready(out_big)
    np.testing.assert_allclose(np.asarray(out_big),
                               np.asarray(reference(x_big, w_gate, w_emb)),
                               rtol=1e-5, atol=1e-5)

    print("KERNEL_OK")
</pallas_src>

<mosaic_0001>
module attributes {stable_mosaic.version = 11 : i64} {
  func.func @point_embedding_kernel(%arg0: i32, %arg1: memref<16x1xf32, #tpu.memory_space<vmem>>, %arg2: memref<1x128xf32, #tpu.memory_space<vmem>>, %arg3: memref<1x128xf32, #tpu.memory_space<vmem>>, %arg4: memref<16x128xf32, #tpu.memory_space<vmem>>) attributes {dimension_semantics = [#tpu.dimension_semantics<parallel>], iteration_bounds = array<i64: 1>, scalar_prefetch = 0 : i64, scratch_operands = 0 : i64, tpu.core_type = #tpu.core_type<tc>, window_params = [{transform_indices = @transform_0, window_bounds = array<i64: 16, 1>}, {pipeline_mode = #tpu.pipeline_mode<synchronous>, transform_indices = @transform_1, window_bounds = array<i64: 1, 128>}, {pipeline_mode = #tpu.pipeline_mode<synchronous>, transform_indices = @transform_2, window_bounds = array<i64: 1, 128>}, {transform_indices = @transform_3, window_bounds = array<i64: 16, 128>}]} {
    %c0 = arith.constant 0 : index
    %c0_0 = arith.constant 0 : index
    %0 = vector.load %arg1[%c0, %c0_0] : memref<16x1xf32, #tpu.memory_space<vmem>>, vector<16x1xf32>
    %c0_1 = arith.constant 0 : index
    %c0_2 = arith.constant 0 : index
    %1 = vector.load %arg2[%c0_1, %c0_2] : memref<1x128xf32, #tpu.memory_space<vmem>>, vector<1x128xf32>
    %2 = vector.broadcast %0 : vector<16x1xf32> to vector<16x128xf32>
    %3 = vector.broadcast %1 : vector<1x128xf32> to vector<16x128xf32>
    %4 = arith.mulf %2, %3 : vector<16x128xf32>
    %c0_3 = arith.constant 0 : index
    %c0_4 = arith.constant 0 : index
    %5 = vector.load %arg3[%c0_3, %c0_4] : memref<1x128xf32, #tpu.memory_space<vmem>>, vector<1x128xf32>
    %6 = vector.broadcast %0 : vector<16x1xf32> to vector<16x128xf32>
    %7 = vector.broadcast %5 : vector<1x128xf32> to vector<16x128xf32>
    %8 = arith.mulf %6, %7 : vector<16x128xf32>
    %9 = arith.negf %4 : vector<16x128xf32>
    %10 = math.exp %9 : vector<16x128xf32>
    %cst = arith.constant 1.000000e+00 : f32
    %11 = vector.broadcast %cst : f32 to vector<16x128xf32>
    %12 = arith.addf %11, %10 : vector<16x128xf32>
    %13 = arith.divf %11, %12 : vector<16x128xf32>
    %14 = arith.mulf %4, %13 : vector<16x128xf32>
    %15 = arith.mulf %14, %8 : vector<16x128xf32>
    %c0_5 = arith.constant 0 : index
    %c0_6 = arith.constant 0 : index
    %16 = vector.load %arg4[%c0_5, %c0_6] : memref<16x128xf32, #tpu.memory_space<vmem>>, vector<16x128xf32>
    tpu.vector_store %arg4[%c0_5, %c0_6], %15 {strides = array<i32>} : memref<16x128xf32, #tpu.memory_space<vmem>>, vector<16x128xf32>,
    return
  }
  func.func @transform_0(%arg0: i32) -> (i32, i32) {
    %c0_i32 = arith.constant 0 : i32
    %c0_i32_0 = arith.constant 0 : i32
    return %arg0, %c0_i32 : i32, i32
  }
  func.func @transform_1(%arg0: i32) -> (i32, i32) {
    %c0_i32 = arith.constant 0 : i32
    %c0_i32_0 = arith.constant 0 : i32
    %c0_i32_1 = arith.constant 0 : i32
    return %c0_i32, %c0_i32_0 : i32, i32
  }
  func.func @transform_2(%arg0: i32) -> (i32, i32) {
    %c0_i32 = arith.constant 0 : i32
    %c0_i32_0 = arith.constant 0 : i32
    %c0_i32_1 = arith.constant 0 : i32
    return %c0_i32, %c0_i32_0 : i32, i32
  }
  func.func @transform_3(%arg0: i32) -> (i32, i32) {
    %c0_i32 = arith.constant 0 : i32
    %c0_i32_0 = arith.constant 0 : i32
    return %arg0, %c0_i32 : i32, i32
  }
}

</mosaic_0001>

<bundles_post_ra>
// kernel: tpu_custom_call.1
= control target key start
LH: loop header
LB: loop body
LE: loop exit
PB: predicated region body
PF: predicated region fallthrough
CT: control target
= control target key end

     0   :  { %v144_v1 = vmov 0   ;;  %s183_s0 = inlined_call_operand.vmem [shape: f32[16,1], index: 0, kind: input, shape index: {}]   ;;  %s184_s1 = inlined_call_operand.vmem [shape: f32[1,128], index: 1, kind: input, shape index: {}]   ;;  %s185_s2 = inlined_call_operand.vmem [shape: f32[1,128], index: 2, kind: input, shape index: {}]   ;;  %s186_s3 = inlined_call_operand.hbm [shape: f32[16,128], index: 3, kind: output, shape index: {}]  }
   0x1   :  { %v15_v0 = vld [vmem:[%s183_s0] sm:$0xff]  ;;  %107 = vset.pattern.permute.xlu0 %v144_v1 }
   0x2   :  { %20 = vperm.xlu0 %107, %v15_v0  }
   0x3   :  { %8 = vsyncpa [#allocation3], 0  ;;  %v16_v2 = vld [vmem:[%s183_s0 + $0x8] sm:$0xff]  ;;  %v108_v3 = vld [vmem:[%s184_s1] ss:$0 sm:$0xff]  ;;  %s89_s21 = sshll.u32 %s186_s3, 4  ;;  %s90_s21 = int_to_ptr.hbm [resolvable:$true] %s89_s21 }
   0x4   :  { %v109_v20 = vld [vmem:[%s185_s2] ss:$0 sm:$0xff]  ;;  %s145_s2 = smov [#allocation2]   ;;  %s146_s22 = smov 128  }
   0x5   :  { %s87_s18 = sshll.u32 %s145_s2, 4  ;;  %s147_s23 = smov 8   ;;  %s88_s18 = int_to_ptr.vmem [resolvable:$true] %s87_s18 }
   0xa   :  { %25 = vperm.xlu0 %107, %v16_v2  }
  0x74   :  { %v21_v4 = vpop.permute.xlu0 %20 }
  0x75   :  { %v31_v5 = vmul.f32 %v108_v3, %v21_v4  ;;  %v37_v27 = vmul.f32 %v109_v20, %v21_v4 }
  0x77   :  { %v101_v6 = vmul.f32 -1.442695, %v31_v5 }
  0x79   :  { %110 = vpow2.f32 %v101_v6 }
  0x7c   :  { %v26_v7 = vpop.permute.xlu0 %25 }
  0x7d   :  { %v32_v8 = vmul.f32 %v108_v3, %v26_v7  ;;  %v38_v38 = vmul.f32 %v109_v20, %v26_v7 }
  0x7f   :  { %v111_v9 = vpop.eup %110  ;;  %v102_v10 = vmul.f32 -1.442695, %v32_v8 }
  0x80   :  { %v45_v11 = vadd.f32 1.0, %v111_v9 }
  0x81   :  { %112 = vpow2.f32 %v102_v10 }
  0x82   :  { %114 = vrcp.f32 %v45_v11  ;;  %v58_v17 = vand.u32 2147483648, %v45_v11  ;;  %v56_v19 = vand.u32 2147483647, %v45_v11  ;;  %vm52_vm1 = vweird.f32 %v45_v11 }
  0x84   :  { %v59_v23 = vor.u32 1.1754944e-38, %v58_v17  ;;  %vm57_vm3 = vcmp.eq.f32.partialorder %v56_v19, 8.507059e+37 }
  0x87   :  { %v113_v12 = vpop.eup %112 }
  0x88   :  { %v115_v13 = vpop.eup %114  ;;  %v46_v14 = vadd.f32 1.0, %v113_v12 }
  0x89   :  { %v48_v15 = vmul.f32 %v115_v13, %v45_v11  ;;  %vm53_vm0 = vweird.f32 %v115_v13 }
  0x8a   :  { %116 = vrcp.f32 %v46_v14  ;;  %vm54_vm2 = vmor %vm52_vm1, %vm53_vm0  ;;  %v73_v30 = vand.u32 2147483648, %v46_v14  ;;  %v71_v33 = vand.u32 2147483647, %v46_v14  ;;  %vm67_vm5 = vweird.f32 %v46_v14 }
  0x8b   :  { %v49_v16 = vsub.f32 1.0, %v48_v15 }
  0x8c   :  { %v74_v35 = vor.u32 1.1754944e-38, %v73_v30  ;;  %vm72_vm7 = vcmp.eq.f32.partialorder %v71_v33, 8.507059e+37 }
  0x8d   :  { %v50_v18 = vmul.f32 %v115_v13, %v49_v16 }
  0x8f   :  { %v51_v21 = vadd.f32 %v115_v13, %v50_v18 }
  0x90   :  { %v117_v22 = vpop.eup %116 }
  0x91   :  { %v55_v24 = vsel %vm54_vm2, %v115_v13, %v51_v21  ;;  %v63_v25 = vmul.f32 %v117_v22, %v46_v14  ;;  %vm68_vm4 = vweird.f32 %v117_v22 }
  0x92   :  { %v60_v26 = vsel %vm57_vm3, %v59_v23, %v55_v24  ;;  %vm69_vm6 = vmor %vm67_vm5, %vm68_vm4 }
  0x93   :  { %v77_v28 = vmul.f32 %v60_v26, %v31_v5  ;;  %v64_v29 = vsub.f32 1.0, %v63_v25 }
  0x95   :  { %v79_v31 = vmul.f32 %v77_v28, %v37_v27  ;;  %v65_v32 = vmul.f32 %v117_v22, %v64_v29 }
  0x97   :  { %81 = vst [vmem:[#allocation2] sm:$0xff] %v79_v31  ;;  %v66_v34 = vadd.f32 %v117_v22, %v65_v32 }
  0x99   :  { %v70_v36 = vsel %vm69_vm6, %v117_v22, %v66_v34 }
  0x9a   :  { %v75_v37 = vsel %vm72_vm7, %v74_v35, %v70_v36 }
  0x9b   :  { %v78_v39 = vmul.f32 %v75_v37, %v32_v8 }
  0x9d   :  { %v80_v40 = vmul.f32 %v78_v39, %v38_v38 }
  0x9f   :  { %82 = vst [vmem:[#allocation2 + $0x8] sm:$0xff] %v80_v40 }
  0xa0   :  { %95 = dma.vmem_to_hbm [thread:$0]  %s88_s18, 256, %s90_s21, [#allocation3], %s146_s22, %s146_s22, %s147_s23  }
  0xa1   :  { %142 = dma.done.wait [#allocation3], 256  }
  0xa2   :  { %143 = vsyncadd [#allocation3], 4294967040 }
  0xa3   :  { %100 = vsyncpa [#allocation3], 1 }

</bundles_post_ra>
